<compile_context>
chip_gen: v7x
topology: tpu7x:2x2x1
jax: 0.10.0
libtpu: 0.0.40
codegen_flags: <defaults>
</compile_context>

<pallas_src>
import jax
import jax.numpy as jnp
from jax.experimental import pallas as pl
from jax.experimental.pallas import tpu as pltpu


# --------------------------------------------------------------------------- #
# Kernels
# --------------------------------------------------------------------------- #
def _conv_bn_direct_kernel(x_ref, w_ref, b_ref, o_ref):
    """out = W_folded @ x_tile + bias ; full K resident, direct store."""
    x = x_ref[...].astype(jnp.bfloat16)          # no-op if already bf16
    acc = jnp.dot(w_ref[...], x, preferred_element_type=jnp.float32)
    o_ref[...] = (acc + b_ref[...]).astype(o_ref.dtype)


def _conv_bn_ktiled_kernel(x_ref, w_ref, b_ref, o_ref, acc_ref):
    """Same computation with a K reduction grid axis (big-K layers)."""
    k = pl.program_id(2)

    @pl.when(k == 0)
    def _init():
        acc_ref[...] = jnp.zeros_like(acc_ref)

    x = x_ref[...].astype(jnp.bfloat16)
    acc_ref[...] += jnp.dot(w_ref[...], x, preferred_element_type=jnp.float32)

    @pl.when(k == pl.num_programs(2) - 1)
    def _store():
        o_ref[...] = (acc_ref[...] + b_ref[...]).astype(o_ref.dtype)


# --------------------------------------------------------------------------- #
# Tiling plan
# --------------------------------------------------------------------------- #
def _round_up(v, m):
    return (v + m - 1) // m * m


def _plan_tiles(K, Cout, HW, N, x_elem_bytes, budget_bytes):
    """Pick (thw, tk).  tk=None -> full K resident (direct-store kernel)."""

    def est(thw, kblk, with_acc):
        # double-buffered x / w / out blocks (+ f32 accumulator scratch)
        b = 2 * (Cout * kblk * 2 + kblk * thw * x_elem_bytes + Cout * thw * 4)
        b += 2 * Cout * 4
        if with_acc:
            b += Cout * thw * 4
        return b

    # Lane tile over Ho*Wo: full extent when small (always a legal block),
    # otherwise a large multiple of 128 (never degenerate-small tiles).
    thw_candidates = [HW] if HW <= 1024 else [1024, 512, 256]

    thw, tk = None, None
    for cand in thw_candidates:
        if est(cand, K, with_acc=False) <= budget_bytes:
            thw, tk = cand, None
            break
    if thw is None:
        thw = thw_candidates[-1]
        tk = 128
        for cand_tk in (2048, 1024, 512, 256, 128):
            if est(thw, cand_tk, with_acc=True) <= budget_bytes:
                tk = cand_tk
                break

    # v7x megacore: make sure there are >= 2 parallel grid steps when cheap.
    n_hw = -(-HW // thw)
    if N * n_hw < 2 and HW >= 256:
        thw = _round_up((HW + 1) // 2, 128)

    return thw, tk


# --------------------------------------------------------------------------- #
# Wrapper
# --------------------------------------------------------------------------- #
def linear_block_forward(x, weight, gamma, beta, running_mean, running_var,
                         *, stride=(1, 1), padding=(0, 0), groups=1,
                         eps=1e-5, force_tk=None,
                         vmem_budget_bytes=24 * 1024 * 1024):
    """Forward pass of Linear_block (Conv2d no-bias + BatchNorm2d, eval mode).

    x:      (N, Cin, H, W)        NCHW
    weight: (Cout, Cin, kh, kw)
    gamma, beta, running_mean, running_var: (Cout,)
    returns (N, Cout, Ho, Wo)     NCHW
    """
    # TODO(synk): grouped / depthwise conv (groups > 1, e.g. the 7x7 GDC layer)
    # is not implemented in this kernel.
    assert groups == 1
    x = jnp.asarray(x)
    N, Cin, H, W = x.shape
    Cout, Cin_w, kh, kw = weight.shape
    assert Cin_w == Cin
    sh, sw = stride
    ph, pw = padding

    Ho = (H + 2 * ph - kh) // sh + 1
    Wo = (W + 2 * pw - kw) // sw + 1
    HW = Ho * Wo

    # ---- activations: stay NCHW; channels (*kh*kw) is the contraction dim ----
    if kh == 1 and kw == 1 and ph == 0 and pw == 0:
        if sh == 1 and sw == 1:
            # Pure reshape, no HBM copy; the kernel casts f32 -> bf16 itself.
            xk = x.reshape(N, Cin, HW)
        else:
            # Strided slice is already a copy; fuse the bf16 cast into it.
            xk = x[:, :, ::sh, ::sw].reshape(N, Cin, HW).astype(jnp.bfloat16)
        K = Cin
    else:
        # TODO(synk): move patch extraction into the kernel (overlapping-window
        # index_map / manual DMA gather) to avoid kh*kw-duplicated HBM traffic.
        xp = jnp.pad(x, ((0, 0), (0, 0), (ph, ph), (pw, pw)))
        cols = []
        for i in range(kh):
            for j in range(kw):
                cols.append(xp[:, :, i:i + sh * Ho:sh, j:j + sw * Wo:sw])
        patches = jnp.stack(cols, axis=2)                 # (N, Cin, kh*kw, Ho, Wo)
        K = Cin * kh * kw
        xk = patches.reshape(N, K, HW).astype(jnp.bfloat16)

    # ---- weights: fold BN scale, cast to bf16; bias stays f32 ----------------
    inv_std = jax.lax.rsqrt(running_var.astype(jnp.float32) + eps)
    scale = gamma.astype(jnp.float32) * inv_std                       # (Cout,)
    bias = beta.astype(jnp.float32) - running_mean.astype(jnp.float32) * scale
    wk = weight.reshape(Cout, K).astype(jnp.float32)
    wf = (wk * scale[:, None]).astype(jnp.bfloat16)                   # (Cout, K)
    bias2 = bias.reshape(Cout, 1)                                     # (Cout, 1)

    # ---- tiling plan ----------------------------------------------------------
    x_elem_bytes = jnp.dtype(xk.dtype).itemsize
    thw, tk = _plan_tiles(K, Cout, HW, N, x_elem_bytes, vmem_budget_bytes)
    if force_tk is not None:
        tk = force_tk
    n_hw = -(-HW // thw)

    cost = pl.CostEstimate(
        flops=2 * N * HW * K * Cout,
        transcendentals=0,
        bytes_accessed=int(xk.size) * x_elem_bytes + int(wf.size) * 2
        + N * Cout * HW * 4 + Cout * 8)

    out_shape = jax.ShapeDtypeStruct((N, Cout, HW), jnp.float32)
    compiler_params = lambda dims: pltpu.CompilerParams(
        dimension_semantics=dims, vmem_limit_bytes=48 * 1024 * 1024)

    if tk is None:
        # Full-K resident weights, direct store (no accumulator scratch).
        grid = (N, n_hw)
        out = pl.pallas_call(
            _conv_bn_direct_kernel,
            out_shape=out_shape,
            grid_spec=pltpu.PrefetchScalarGridSpec(
                num_scalar_prefetch=0,
                grid=grid,
                in_specs=[
                    pl.BlockSpec((None, K, thw), lambda n, h: (n, 0, h)),
                    # TODO(synk): single-buffer the grid-invariant operands
                    # (pipeline_mode=pl.Buffered(1)) once verified on Mosaic.
                    pl.BlockSpec((Cout, K), lambda n, h: (0, 0)),
                    pl.BlockSpec((Cout, 1), lambda n, h: (0, 0)),
                ],
                out_specs=pl.BlockSpec((None, Cout, thw), lambda n, h: (n, 0, h)),
            ),
            compiler_params=compiler_params(("parallel", "parallel")),
            cost_estimate=cost,
        )(xk, wf, bias2)
    else:
        # Big K: tile the contraction dim with an f32 accumulator scratch.
        tk = max(128, _round_up(tk, 128))
        Kp = _round_up(K, tk)
        if Kp != K:
            # Zero-pad K so every K block is full (zero rows contribute nothing).
            xk = jnp.pad(xk, ((0, 0), (0, Kp - K), (0, 0)))
            wf = jnp.pad(wf, ((0, 0), (0, Kp - K)))
        n_k = Kp // tk
        grid = (N, n_hw, n_k)
        out = pl.pallas_call(
            _conv_bn_ktiled_kernel,
            out_shape=out_shape,
            grid_spec=pltpu.PrefetchScalarGridSpec(
                num_scalar_prefetch=0,
                grid=grid,
                in_specs=[
                    pl.BlockSpec((None, tk, thw), lambda n, h, k: (n, k, h)),
                    pl.BlockSpec((Cout, tk), lambda n, h, k: (0, k)),
                    pl.BlockSpec((Cout, 1), lambda n, h, k: (0, 0)),
                ],
                out_specs=pl.BlockSpec((None, Cout, thw),
                                       lambda n, h, k: (n, 0, h)),
                scratch_shapes=[pltpu.VMEM((Cout, thw), jnp.float32)],
            ),
            compiler_params=compiler_params(
                ("parallel", "parallel", "arbitrary")),
            cost_estimate=cost,
        )(xk, wf, bias2)

    # Pure reshape back to NCHW (no transpose).
    return out.reshape(N, Cout, Ho, Wo)


# --------------------------------------------------------------------------- #
# Reference + self-test
# --------------------------------------------------------------------------- #
def _reference(x, weight, gamma, beta, running_mean, running_var,
               stride=(1, 1), padding=(0, 0), eps=1e-5):
    y = jax.lax.conv_general_dilated(
        x, weight, window_strides=stride,
        padding=[(padding[0], padding[0]), (padding[1], padding[1])],
        dimension_numbers=("NCHW", "OIHW", "NCHW"))
    g = gamma.reshape(1, -1, 1, 1)
    b = beta.reshape(1, -1, 1, 1)
    m = running_mean.reshape(1, -1, 1, 1)
    v = running_var.reshape(1, -1, 1, 1)
    return (y - m) / jnp.sqrt(v + eps) * g + b


def _make_case(key, N, Cin, H, W, Cout, kh, kw):
    ks = jax.random.split(key, 6)
    x = jax.random.normal(ks[0], (N, Cin, H, W), dtype=jnp.float32)
    w = jax.random.normal(ks[1], (Cout, Cin, kh, kw), dtype=jnp.float32) * 0.1
    gamma = jax.random.normal(ks[2], (Cout,), dtype=jnp.float32) * 0.1 + 1.0
    beta = jax.random.normal(ks[3], (Cout,), dtype=jnp.float32) * 0.1
    mean = jax.random.normal(ks[4], (Cout,), dtype=jnp.float32) * 0.1
    var = jax.random.uniform(ks[5], (Cout,), dtype=jnp.float32,
                             minval=0.5, maxval=1.5)
    return x, w, gamma, beta, mean, var


if __name__ == "__main__":
    key = jax.random.PRNGKey(0)
    k1, k2, k3 = jax.random.split(key, 3)
    TOL = dict(atol=3e-2, rtol=3e-2)   # bf16 MXU inputs, f32 accumulation

    # Case 1: Linear_block defaults — kernel=(1,1), stride=(1,1), padding=(0,0).
    x, w, g, b, m, v = _make_case(k1, 2, 32, 16, 16, 64, 1, 1)
    out = jax.block_until_ready(linear_block_forward(x, w, g, b, m, v))
    ref = _reference(x, w, g, b, m, v)
    assert out.shape == ref.shape, (out.shape, ref.shape)
    assert jnp.allclose(out, ref, **TOL), float(jnp.max(jnp.abs(out - ref)))

    # Case 2: 3x3 stride-2 padded conv (exercises the im2col path).
    x, w, g, b, m, v = _make_case(k2, 2, 16, 16, 16, 32, 3, 3)
    out = jax.block_until_ready(
        linear_block_forward(x, w, g, b, m, v, stride=(2, 2), padding=(1, 1)))
    ref = _reference(x, w, g, b, m, v, stride=(2, 2), padding=(1, 1))
    assert out.shape == ref.shape, (out.shape, ref.shape)
    assert jnp.allclose(out, ref, **TOL), float(jnp.max(jnp.abs(out - ref)))

    # Case 3: force the K-reduction (big-K) path, incl. zero-padded K tail.
    x, w, g, b, m, v = _make_case(k3, 2, 192, 8, 8, 64, 1, 1)
    out = jax.block_until_ready(
        linear_block_forward(x, w, g, b, m, v, force_tk=128))
    ref = _reference(x, w, g, b, m, v)
    assert out.shape == ref.shape, (out.shape, ref.shape)
    assert jnp.allclose(out, ref, **TOL), float(jnp.max(jnp.abs(out - ref)))

    print("KERNEL_OK")
</pallas_src>

<mosaic_0001>
module attributes {stable_mosaic.version = 11 : i64} {
  func.func @_conv_bn_direct_kernel(%arg0: i32, %arg1: i32, %arg2: memref<1x32x256xf32, #tpu.memory_space<vmem>>, %arg3: memref<64x32xbf16, #tpu.memory_space<vmem>>, %arg4: memref<64x1xf32, #tpu.memory_space<vmem>>, %arg5: memref<1x64x256xf32, #tpu.memory_space<vmem>>) attributes {dimension_semantics = [#tpu.dimension_semantics<parallel>, #tpu.dimension_semantics<parallel>], iteration_bounds = array<i64: 2, 1>, scalar_prefetch = 0 : i64, scratch_operands = 0 : i64, tpu.core_type = #tpu.core_type<tc>, window_params = [{transform_indices = @transform_0, window_bounds = array<i64: 1, 32, 256>}, {pipeline_mode = #tpu.pipeline_mode<synchronous>, transform_indices = @transform_1, window_bounds = array<i64: 64, 32>}, {pipeline_mode = #tpu.pipeline_mode<synchronous>, transform_indices = @transform_2, window_bounds = array<i64: 64, 1>}, {transform_indices = @transform_3, window_bounds = array<i64: 1, 64, 256>}]} {
    %c0 = arith.constant 0 : index
    %c0_0 = arith.constant 0 : index
    %c0_1 = arith.constant 0 : index
    %0 = vector.load %arg2[%c0, %c0_0, %c0_1] : memref<1x32x256xf32, #tpu.memory_space<vmem>>, vector<1x32x256xf32>
    %1 = vector.shape_cast %0 : vector<1x32x256xf32> to vector<32x256xf32>
    %2 = arith.truncf %1 : vector<32x256xf32> to vector<32x256xbf16>
    %c0_2 = arith.constant 0 : index
    %c0_3 = arith.constant 0 : index
    %3 = vector.load %arg3[%c0_2, %c0_3] : memref<64x32xbf16, #tpu.memory_space<vmem>>, vector<64x32xbf16>
    %cst = arith.constant dense<0.000000e+00> : vector<64x256xf32>
    %4 = tpu.matmul %3, %2, %cst {dimension_numbers = #tpu.dot_dimension_numbers<[1], [0], [0], [1], [0, 0, 1, 1], [], []>} : vector<64x32xbf16>, vector<32x256xbf16>, vector<64x256xf32> -> vector<64x256xf32>
    %c0_4 = arith.constant 0 : index
    %c0_5 = arith.constant 0 : index
    %5 = vector.load %arg4[%c0_4, %c0_5] : memref<64x1xf32, #tpu.memory_space<vmem>>, vector<64x1xf32>
    %6 = vector.broadcast %5 : vector<64x1xf32> to vector<64x256xf32>
    %7 = arith.addf %4, %6 : vector<64x256xf32>
    %c0_6 = arith.constant 0 : index
    %c0_7 = arith.constant 0 : index
    %c0_8 = arith.constant 0 : index
    %8 = vector.load %arg5[%c0_6, %c0_7, %c0_8] : memref<1x64x256xf32, #tpu.memory_space<vmem>>, vector<1x64x256xf32>
    %9 = vector.shape_cast %8 : vector<1x64x256xf32> to vector<64x256xf32>
    %10 = vector.shape_cast %7 : vector<64x256xf32> to vector<1x64x256xf32>
    tpu.vector_store %arg5[%c0_6, %c0_7, %c0_8], %10 {strides = array<i32>} : memref<1x64x256xf32, #tpu.memory_space<vmem>>, vector<1x64x256xf32>,
    return
  }
  func.func @transform_0(%arg0: i32, %arg1: i32) -> (i32, i32, i32) {
    %c0_i32 = arith.constant 0 : i32
    %c0_i32_0 = arith.constant 0 : i32
    return %arg0, %c0_i32, %arg1 : i32, i32, i32
  }
  func.func @transform_1(%arg0: i32, %arg1: i32) -> (i32, i32) {
    %c0_i32 = arith.constant 0 : i32
    %c0_i32_0 = arith.constant 0 : i32
    %c0_i32_1 = arith.constant 0 : i32
    return %c0_i32, %c0_i32_0 : i32, i32
  }
  func.func @transform_2(%arg0: i32, %arg1: i32) -> (i32, i32) {
    %c0_i32 = arith.constant 0 : i32
    %c0_i32_0 = arith.constant 0 : i32
    %c0_i32_1 = arith.constant 0 : i32
    return %c0_i32, %c0_i32_0 : i32, i32
  }
  func.func @transform_3(%arg0: i32, %arg1: i32) -> (i32, i32, i32) {
    %c0_i32 = arith.constant 0 : i32
    %c0_i32_0 = arith.constant 0 : i32
    return %arg0, %c0_i32, %arg1 : i32, i32, i32
  }
}

</mosaic_0001>

<bundles_post_ra>
// kernel: tpu_custom_call.1
= control target key start
LH: loop header
LB: loop body
LE: loop exit
PB: predicated region body
PF: predicated region fallthrough
CT: control target
= control target key end

     0   :  { %8 = vsyncpa [#allocation3], 0  ;;  %s981_s0 = inlined_call_operand.hbm [shape: f32[2,32,256], index: 0, kind: input, shape index: {}]   ;;  %s982_s1 = inlined_call_operand.vmem [shape: bf16[64,32], index: 1, kind: input, shape index: {}]   ;;  %s983_s2 = inlined_call_operand.vmem [shape: f32[64,1], index: 2, kind: input, shape index: {}]   ;;  %s984_s3 = inlined_call_operand.hbm [shape: f32[2,64,256], index: 3, kind: output, shape index: {}]  }
   0x1   :  { %10 = vsyncpa [#allocation3 + $0x1], 0 }
   0x2   :  { %11 = vsyncpa [#allocation4], 0 }
   0x3   :  { %13 = vsyncpa [#allocation4 + $0x1], 0  ;;  %s746_s12 = smov 0   ;;  %s748_s13 = smov 0  }
   0x4   :  { %s750_s14 = smov 0   ;;  %s752_s15 = smov 0  }
   0x5   :  { %s754_s16 = smov 0   ;;  %s756_s17 = smov 0  }
   0x6 LB: > { %s503_s18 = sadd.s32 4294967295, %s717_s17   ;;  %s504_s19 = sadd.s32 4294967294, %s717_s17   ;;  %s717_s17 = sphi %s756_s17, %s19_s17   ;;  %s713_s16 = sphi %s754_s16, %s999_s16   ;;  %s709_s15 = sphi %s752_s15, %s998_s15   ;;  %s705_s14 = sphi %s750_s14, %s997_s14   ;;  %s701_s13 = sphi %s748_s13, %s996_s13   ;;  %s697_s12 = sphi %s746_s12, %s995_s12  }
   0x7   : > { %s31_s20 = sadd.s32 1, %s713_s16  ;;  %s40_s21 = sadd.s32 1, %s705_s14 }
   0x8   : > { %p33_p0 = scmp.ge.s32.totalorder %s31_s20, 2  ;;  %p47_p1 = scmp.ne.s32.totalorder %s705_s14, %s701_s13 }
   0x9   : > { %p48_p2 = scmp.eq.s32.totalorder %s717_s17, 0  ;;  %p53_p3 = scmp.ne.s32.totalorder %s701_s13, %s697_s12 }
   0xa   : > { %s1001_s20 = smov (%p33_p0, %s31_s20), 0  ;;  %p54_p5 = scmp.eq.s32.totalorder %s503_s18, 0 }
   0xb   : > { %p787_p4 = por %p48_p2, %p47_p1  ;;  %s35_s23 = ssub.s32 %s713_s16, %s1001_s20 }
   0xc   : > { %p121_p6 = scmp.eq.s32.totalorder %s503_s18, 1  ;;  %p38_p7 = scmp.eq.s32.totalorder %s35_s23, 0 }
   0xd   : > { %p793_p8 = por %p54_p5, %p53_p3  ;;  %p127_p10 = scmp.eq.s32.totalorder %s504_s19, 1 }
   0xe   : > { %p797_p9 = por %p121_p6, %p47_p1  ;;  %p544_p13 = scmp.lt.s32.totalorder %s717_s17, 2 }
   0xf   : > { %s802_s26 = scalar_select %p38_p7, %s705_s14, %s40_s21  }
  0x10   : > { %s988_s25 = scalar_select %p797_p9, 1, 0 }
  0x11   : > { %p804_p11 = por %p127_p10, %p53_p3  ;;  %s153_s28 = sand.u32 1, %s705_s14  }
  0x12   : > { %s507_s29 = sshll.u32 %s153_s28, 6  ;;  %s526_s30 = sshll.u32 %s713_s16, 10 }
  0x13   : > { %s989_s27 = scalar_select %p804_p11, 1, 0 }
  0x14   : > { %s815_s6 = scalar_lea.hbm %s981_s0, %s526_s30  ;;  %s157_s7 = scalar_lea.vmem [#allocation2], %s507_s29 }
  0x15   : > { %s166_s8 = sshll.u32 %s157_s7, 4  ;;  %p821_p0 = pnand %p544_p13, %p787_p4  ;;  %s817_s8 = int_to_ptr.vmem [resolvable:$true] %s166_s8 }
  0x16   : > { %s826_s10 = scalar_lea.sflag [#allocation3], %s153_s28  ;;  %s605_s11 = scalar_lea.hbm %s815_s6, 1024 }
  0x17   : > { %p606_p2 = scmp.ne.s32.totalorder %s815_s6, %s605_s11  ;;  %p607_p3 = pneg %p821_p0 }
  0x18   : > { %s610_s21 = scalar_lea.hbm %s981_s0, 2048  ;;  %p611_p4 = scmp.lt.u32.totalorder %s815_s6, %s981_s0 }
  0x19   : > { %p608_p5 = pnand %p607_p3, %p606_p2  ;;  %p612_p7 = scmp.lt.u32.totalorder %s610_s21, %s605_s11 }
  0x1a   : > { %p614_p13 = scmp.lt.u32.totalorder %s605_s11, %s815_s6 }
  0x1b   : > { %p609_p6 = pneg %p608_p5  ;;  %p613_p10 = por %p612_p7, %p611_p4 }
  0x1d   : > { %p615_p12 = por %p614_p13, %p613_p10 }
  0x1f   : > { %p616_p1 = pnand %p615_p12, %p609_p6 }
  0x21   : > { %619 = shalt.err (!%p616_p1)
}
  0x22   : > { %s620_s28 = scalar_lea.vmem %s817_s8, 1024  ;;  %s719_s29 = smov [#allocation2]  }
  0x23   : > { %p621_p2 = scmp.ne.s32.totalorder %s817_s8, %s620_s28  ;;  %s625_s30 = sshll.u32 %s719_s29, 4  ;;  %s626_s30 = int_to_ptr.vmem [resolvable:$false] %s625_s30 }
  0x24   : > { %s627_s4 = scalar_lea.vmem %s626_s30, 2048  ;;  %p628_p9 = scmp.lt.s32.totalorder %s817_s8, %s626_s30 }
  0x25   : > { %p623_p5 = pnand %p621_p2, %p607_p3  ;;  %p629_p4 = scmp.lt.s32.totalorder %s627_s4, %s620_s28 }
  0x27   : > { %p624_p11 = pneg %p623_p5  ;;  %p630_p7 = por %p629_p4, %p628_p9 }
  0x29   : > { %p631_p10 = pnand %p630_p7, %p624_p11 }
  0x2b   : > { %634 = shalt.err (!%p631_p10)
}
  0x2c   : > { %s720_s5 = smov 256   ;;  %s721_s7 = smov 16  }
  0x2d   : > { %539 = dma.hbm_to_vmem [thread:$0]  (!%p821_p0), %s815_s6, 1024, %s817_s8, %s826_s10, %s720_s5, %s720_s5, %s721_s7  }
  0x2e   : > { %p174_p12 = scmp.lt.s32.totalorder %s717_s17, 3  ;;  %p991_p1 = scmp.ge.s32.totalorder %s717_s17, 1 }
  0x30   : > { %p175_p3 = pnand %p991_p1, %p174_p12 }
  0x31   : > { %s858_s11 = sand.u32 (!%p175_p3), 1, %s701_s13  }
  0x32   : > { %178 = sbr.rel (%p175_p3) target bundleno = 309 (0x135), region = 32  ;;  %s511_s18 = sshll.u32 (!%p175_p3), %s858_s11, 6 }
  0x33   : > { %s181_s19 = scalar_lea.sflag (!%p175_p3), [#allocation3], %s858_s11  ;;  %s184_s21 = scalar_lea.vmem (!%p175_p3), [#allocation2], %s511_s18 }
  0x39   : > { %688 = dma.done.wait (%p793_p8), %s181_s19, 1024  }
  0x3a   : > { %690 = vsyncadd (%p793_p8), %s181_s19, 4294966272  ;;  %v722_v0 = vmov 0   ;;  %v211_v1 = vld [vmem:[%s184_s21 + $0x8] sm:$0xff]  ;;  %v213_v2 = vld [vmem:[%s184_s21 + $0x18] sm:$0xff]  ;;  %vm298_vm0 = vcmask 261120   ;;  %s512_s29 = sshll.u32 %s858_s11, 7 }
  0x3b   : > { %343 = vmatprep.mubr.bf16.mxu0 %v722_v0  ;;  %363 = vmatprep.mubr.bf16.mxu1 %v722_v0  ;;  %v210_v3 = vld [vmem:[%s184_s21] sm:$0xff]  ;;  %v219_v4 = vpack.c.bf16 %v213_v2, %v211_v1  ;;  %v212_v5 = vld [vmem:[%s184_s21 + $0x10] sm:$0xff]  ;;  %v215_v6 = vld [vmem:[%s184_s21 + $0x28] sm:$0xff]  ;;  %s907_s30 = scalar_lea.vmem [#allocation5], %s512_s29  ;;  %s527_s4 = sshll.u32 %s709_s15, 11 }
  0x3c   : > { %600 = vset.pattern.permute.xlu1 %v722_v0  ;;  %599 = vset.pattern.permute.xlu0 %v722_v0  ;;  %v217_v7 = vld [vmem:[%s184_s21 + $0x38] sm:$0xff]  ;;  %v218_v8 = vpack.c.bf16 %v212_v5, %v210_v3  ;;  %v214_v10 = vld [vmem:[%s184_s21 + $0x20] sm:$0xff]  ;;  %v216_v11 = vld [vmem:[%s184_s21 + $0x30] sm:$0xff]  ;;  %s416_s5 = sshll.u32 %s907_s30, 4  ;;  %s924_s18 = scalar_lea.hbm %s984_s3, %s527_s4  ;;  %s926_s5 = int_to_ptr.vmem [resolvable:$true] %s416_s5 }
  0x3d   : > { %v221_v9 = vpack.c.bf16 %v217_v7, %v215_v6  ;;  %311 = vmatprep.subr.bf16.mxu0 %v219_v4  ;;  %528 = vmatprep.subr.bf16.mxu1 %v219_v4  ;;  %v220_v12 = vpack.c.bf16 %v216_v11, %v214_v10  ;;  %v232_v13 = vld [vmem:[%s983_s2 + $0x10] sm:$0xff]  ;;  %v601_v14 = vld [vmem:[%s982_s1] sm:$0xff]   ;;  %v233_v17 = vld [vmem:[%s983_s2 + $0x18] sm:$0xff]  ;;  %s401_s19 = scalar_lea.sflag [#allocation4], %s858_s11  ;;  %s635_s21 = scalar_lea.vmem %s926_s5, 2048 }
  0x3e   : > { %312 = vmatpush1.bf16.msra.mxu0 %v218_v8  ;;  %530 = vmatpush1.bf16.msra.mxu1 %v218_v8  ;;  %v602_v15 = vld [vmem:[%s982_s1 + $0x10] sm:$0xff]   ;;  %v230_v16 = vld [vmem:[%s983_s2] sm:$0xff]  ;;  %v231_v18 = vld [vmem:[%s983_s2 + $0x8] sm:$0xff]  ;;  %p636_p8 = scmp.ne.s32.totalorder %s926_s5, %s635_s21  ;;  %p992_p9 = scmp.ne.s32.totalorder %s988_s25, 0 }
  0x3f   : > { %313 = vmatprep.subr.bf16.mxu0 %v221_v9  ;;  %529 = vmatprep.subr.bf16.mxu1 %v221_v9  ;;  %v235_v19 = vld [vmem:[%s983_s2 + $0x28] sm:$0xff]  ;;  %v234_v20 = vld [vmem:[%s983_s2 + $0x20] sm:$0xff]  ;;  %v604_v22 = vld [vmem:[%s982_s1 + $0x18] sm:$0xff]   ;;  %s723_s24 = smov [#allocation5]  }
  0x40   : > { %250 = vperm.xlu1 %600, %v232_v13   ;;  %240 = vperm.xlu0 %599, %v230_v16   ;;  %v603_v21 = vld [vmem:[%s982_s1 + $0x8] sm:$0xff]   ;;  %v237_v23 = vld [vmem:[%s983_s2 + $0x38] sm:$0xff]  ;;  %v236_v24 = vld [vmem:[%s983_s2 + $0x30] sm:$0xff]  ;;  %p637_p11 = pnand %p636_p8, %p992_p9  ;;  %s639_s6 = sshll.u32 %s723_s24, 4  ;;  %s640_s6 = int_to_ptr.vmem [resolvable:$false] %s639_s6 }
  0x41   : > { %s641_s8 = scalar_lea.vmem %s640_s6, 4096  ;;  %p642_p6 = scmp.lt.s32.totalorder %s926_s5, %s640_s6 }
  0x42   : > { %314 = vmatpush1.bf16.msra.mxu0 %v220_v12  ;;  %531 = vmatpush1.bf16.msra.mxu1 %v220_v12  ;;  %p638_p0 = pneg %p637_p11  ;;  %p643_p13 = scmp.lt.s32.totalorder %s641_s8, %s635_s21 }
  0x44   : > { %255 = vperm.xlu1 %600, %v233_v17   ;;  %245 = vperm.xlu0 %599, %v231_v18   ;;  %p644_p2 = por %p643_p13, %p642_p6 }
  0x45   : > { %517 = vmatmul.mubr.msk.bf16.vlgmr.msra.gmra.mrb[0].mxu0 %vm298_vm0, %v601_v14  ;;  %519 = vmatmul.mubr.msk.bf16.vlgmr.msra.gmra.mrb[0].mxu1 %vm298_vm0, %v602_v15 }
  0x46   : > { %353 = vmatprep.mubr.bf16.mxu0 %v722_v0  ;;  %373 = vmatprep.mubr.bf16.mxu1 %v722_v0  ;;  %p645_p5 = pnand %p644_p2, %p638_p0 }
  0x48   : > { %265 = vperm.xlu1 %600, %v235_v19   ;;  %260 = vperm.xlu0 %599, %v234_v20  }
  0x4c   : > { %275 = vperm.xlu1 %600, %v237_v23   ;;  %270 = vperm.xlu0 %599, %v236_v24  }
  0x4d   : > { %518 = vmatmul.mubr.msk.bf16.gmra.mrb[4].mxu0 %vm298_vm0, %v603_v21  ;;  %520 = vmatmul.mubr.msk.bf16.gmra.mrb[4].mxu1 %vm298_vm0, %v604_v22 }
  0xbf   : > { %v251_v25 = vpop.permute.xlu1 %250  ;;  %v241_v26 = vpop.permute.xlu0 %240 }
  0xc3   : > { %v256_v27 = vpop.permute.xlu1 %255  ;;  %v246_v28 = vpop.permute.xlu0 %245 }
  0xc7   : > { %v266_v29 = vpop.permute.xlu1 %265  ;;  %v261_v30 = vpop.permute.xlu0 %260 }
  0xcb   : > { %v276_v47 = vpop.permute.xlu1 %275  ;;  %v271_v48 = vpop.permute.xlu0 %270 }
 0x118   : > { %v345_v31 = vpop.f32.mrb[0].mxu0  ;;  %v365_v32 = vpop.f32.mrb[0].mxu1 }
 0x119   : > { %v346_v33 = vadd.f32 %v345_v31, %v241_v26  ;;  %v366_v34 = vadd.f32 %v365_v32, %v261_v30  ;;  %v347_v35 = vpop.f32.mrb[1].mxu0  ;;  %v367_v36 = vpop.f32.mrb[1].mxu1 }
 0x11a   : > { %v348_v37 = vadd.f32 %v347_v35, %v241_v26  ;;  %v368_v38 = vadd.f32 %v367_v36, %v261_v30  ;;  %v349_v39 = vpop.f32.mrb[2].mxu0  ;;  %v369_v40 = vpop.f32.mrb[2].mxu1 }
 0x11b   : > { %384 = vst [vmem:[%s907_s30] sm:$0xff] %v346_v33  ;;  %392 = vst [vmem:[%s907_s30 + $0x40] sm:$0xff] %v366_v34  ;;  %v350_v41 = vadd.f32 %v349_v39, %v246_v28  ;;  %v370_v42 = vadd.f32 %v369_v40, %v266_v29  ;;  %v351_v43 = vpop.f32.mrb[3].mxu0  ;;  %v371_v44 = vpop.f32.mrb[3].mxu1 }
 0x11c   : > { %385 = vst [vmem:[%s907_s30 + $0x8] sm:$0xff] %v348_v37  ;;  %393 = vst [vmem:[%s907_s30 + $0x48] sm:$0xff] %v368_v38  ;;  %v352_v45 = vadd.f32 %v351_v43, %v246_v28  ;;  %v372_v46 = vadd.f32 %v371_v44, %v266_v29 }
 0x11d   : > { %386 = vst [vmem:[%s907_s30 + $0x10] sm:$0xff] %v350_v41  ;;  %394 = vst [vmem:[%s907_s30 + $0x50] sm:$0xff] %v370_v42 }
 0x11e   : > { %387 = vst [vmem:[%s907_s30 + $0x18] sm:$0xff] %v352_v45  ;;  %395 = vst [vmem:[%s907_s30 + $0x58] sm:$0xff] %v372_v46 }
 0x120   : > { %v355_v49 = vpop.f32.mrb[4].mxu0  ;;  %v375_v50 = vpop.f32.mrb[4].mxu1 }
 0x121   : > { %v356_v51 = vadd.f32 %v355_v49, %v251_v25  ;;  %v376_v52 = vadd.f32 %v375_v50, %v271_v48  ;;  %v357_v53 = vpop.f32.mrb[5].mxu0  ;;  %v377_v54 = vpop.f32.mrb[5].mxu1 }
 0x122   : > { %v358_v55 = vadd.f32 %v357_v53, %v251_v25  ;;  %v378_v56 = vadd.f32 %v377_v54, %v271_v48  ;;  %v359_v57 = vpop.f32.mrb[6].mxu0  ;;  %v379_v58 = vpop.f32.mrb[6].mxu1 }
 0x123   : > { %388 = vst [vmem:[%s907_s30 + $0x20] sm:$0xff] %v356_v51  ;;  %396 = vst [vmem:[%s907_s30 + $0x60] sm:$0xff] %v376_v52  ;;  %v360_v59 = vadd.f32 %v359_v57, %v256_v27  ;;  %v380_v60 = vadd.f32 %v379_v58, %v276_v47  ;;  %v361_v61 = vpop.f32.mrb[7].mxu0  ;;  %v381_v62 = vpop.f32.mrb[7].mxu1 }
 0x124   : > { %389 = vst [vmem:[%s907_s30 + $0x28] sm:$0xff] %v358_v55  ;;  %397 = vst [vmem:[%s907_s30 + $0x68] sm:$0xff] %v378_v56  ;;  %v362_v63 = vadd.f32 %v361_v61, %v256_v27  ;;  %v382_v0 = vadd.f32 %v381_v62, %v276_v47 }
 0x125   : > { %390 = vst [vmem:[%s907_s30 + $0x30] sm:$0xff] %v360_v59  ;;  %398 = vst [vmem:[%s907_s30 + $0x70] sm:$0xff] %v380_v60 }
 0x126   : > { %391 = vst [vmem:[%s907_s30 + $0x38] sm:$0xff] %v362_v63  ;;  %399 = vst [vmem:[%s907_s30 + $0x78] sm:$0xff] %v382_v0 }
 0x127   : > { %648 = shalt.err (!%p645_p5)
}
 0x128   : > { %s649_s9 = scalar_lea.hbm %s924_s18, 2048  ;;  %s653_s23 = scalar_lea.hbm %s984_s3, 4096 }
 0x129   : > { %p650_p4 = scmp.ne.s32.totalorder %s924_s18, %s649_s9  ;;  %p654_p12 = scmp.lt.u32.totalorder %s924_s18, %s984_s3 }
 0x12a   : > { %p655_p1 = scmp.lt.u32.totalorder %s653_s23, %s649_s9  ;;  %p657_p8 = scmp.lt.u32.totalorder %s649_s9, %s924_s18 }
 0x12b   : > { %p651_p7 = pnand %p650_p4, %p992_p9 }
 0x12c   : > { %p656_p3 = por %p655_p1, %p654_p12 }
 0x12d   : > { %p652_p10 = pneg %p651_p7 }
 0x12e   : > { %p658_p11 = por %p657_p8, %p656_p3 }
 0x130   : > { %p659_p0 = pnand %p658_p11, %p652_p10 }
 0x132   : > { %662 = shalt.err (!%p659_p0)
}
 0x133   : > { %s724_s30 = smov 256   ;;  %s725_s4 = smov 16  }
 0x134   : > { %534 = dma.vmem_to_hbm [thread:$0]  (%p992_p9), %s926_s5, 2048, %s924_s18, %s401_s19, %s724_s30, %s724_s30, %s725_s4  }
 0x135 PF: > { %s431_s15 = sand.u32 1, %s697_s12   ;;  %p993_p6 = scmp.ne.s32.totalorder %s989_s27, 0 }
 0x136   : > { %p994_p13 = scmp.ge.s32.totalorder %s717_s17, 2  ;;  %s432_s7 = scalar_lea.sflag [#allocation4], %s431_s15 }
 0x138   : > { %p541_p2 = pnand %p994_p13, %p993_p6 }
 0x13a   : > { %692 = dma.done.wait (!%p541_p2), %s432_s7, 2048  }
 0x13b   : > { %694 = vsyncadd (!%p541_p2), %s432_s7, 4294965248  ;;  %s19_s17 = sadd.s32 1, %s717_s17   ;;  %s995_s12 = smov %s701_s13 }
 0x13c   : > { %p16_p5 = scmp.ge.s32.totalorder %s19_s17, 4   ;;  %s996_s13 = smov %s705_s14 }
 0x13d   : > { %s997_s14 = smov %s802_s26  ;;  %s998_s15 = smov %s713_s16 }
 0x13e   : > { %s999_s16 = smov %s1001_s20  ;;  %18 = sbr.rel (!%p16_p5) target bundleno = 6 (0x6), region = 77 }
 0x145   :  { %437 = vsyncpa [#allocation3], 1 }
 0x146   :  { %439 = vsyncpa [#allocation3 + $0x1], 1 }
 0x147   :  { %440 = vsyncpa [#allocation4], 1 }
 0x148   :  { %442 = vsyncpa [#allocation4 + $0x1], 1 }

</bundles_post_ra>
